<compile_context>
chip_gen: v7x
topology: tpu7x:2x2x1
jax: 0.10.0
libtpu: 0.0.40
codegen_flags: <defaults>
</compile_context>

<pallas_src>
import jax
import jax.numpy as jnp
from jax.experimental import pallas as pl
from jax.experimental.pallas import tpu as pltpu


def _attention_kernel(h_ref, m_ref, w_ref, b_ref, q_ref, out_ref, attn_ref):
    # h_ref:    (TB, S, H) hidden states (possibly bf16)
    # m_ref:    (TB, S)    0/1 mask, lane-dense (seq on lanes), f32
    # w_ref:    (H, H)     projection weight (resident across grid steps)
    # b_ref:    (1, H)     bias (f32)
    # q_ref:    (1, H)     query vector (f32)
    # out_ref:  (TB, H)    pooled outputs (f32)
    # attn_ref: (TB, S)    attention scores (pre-second-mask softmax, f32)
    TB, S, H = h_ref.shape

    # key = hidden @ W + b : one fused (TB*S, H) @ (H, H) MXU matmul with f32
    # accumulation. The reshapes are layout no-ops when S % 8 == 0; for other
    # S Mosaic materializes a VMEM copy (correct, just slower).
    h2 = h_ref[...].reshape(TB * S, H)
    key2 = jnp.dot(h2, w_ref[...], preferred_element_type=jnp.float32)
    key2 = key2 + b_ref[...].astype(jnp.float32)
    key = key2.reshape(TB, S, H)                         # (TB, S, H) f32

    # scores = key @ q : VPU multiply + lane reduction (MXU left free).
    scores = jnp.sum(key * q_ref[...].astype(jnp.float32), axis=-1)  # (TB, S)

    mask = m_ref[...]                                    # (TB, S) 0/1 f32
    masked_scores = jnp.where(mask != 0, scores, jnp.float32(-1e32))

    # f32 softmax over the sequence axis (lane axis -> cheap lane reductions).
    s_max = jnp.max(masked_scores, axis=-1, keepdims=True)
    e = jnp.exp(masked_scores - s_max)
    denom = jnp.sum(e, axis=-1, keepdims=True)
    attn = e * pl.reciprocal(denom, approx=False)        # EUP reciprocal (exact)

    # second masked_fill, then weighted sum over the sequence axis.
    attn_masked = jnp.where(mask != 0, attn, 0.0)        # (TB, S)
    pooled = jnp.sum(attn_masked[..., None] * key, axis=1)   # (TB, H)

    out_ref[...] = pooled.astype(out_ref.dtype)
    attn_ref[...] = attn.astype(attn_ref.dtype)


def _vmem_limit_bytes():
    """Scoped-VMEM limit that is safe across v5e/v6e (128 MiB) and v7x (64 MiB)."""
    try:
        cap = int(pltpu.get_tpu_info().vmem_capacity_bytes)
    except Exception:
        cap = 64 * 1024 * 1024  # conservative: v7x per-core physical VMEM
    return max(32 << 20, min((3 * cap) // 4, 96 << 20))


def _pick_tb(B, S, H, in_itemsize, budget_bytes):
    """Largest tb (multiple of 8, or == B, dividing B) whose per-step footprint
    fits the VMEM budget; prefer >= 2 grid steps so v7x megacore can shard."""
    def footprint(tb):
        hidden_in = 2 * tb * S * H * in_itemsize        # double-buffered input tile
        outputs = 2 * tb * (H + S) * 4                  # double-buffered f32 outputs
        work = 3 * tb * S * H * 4                       # f32 key + broadcast temps
        return hidden_in + outputs + work

    cands = [tb for tb in range(1, B + 1)
             if B % tb == 0 and (tb % 8 == 0 or tb == B)]
    fitting = [tb for tb in cands if footprint(tb) <= budget_bytes]
    if not fitting:
        fitting = [min(cands)]
    multi_step = [tb for tb in fitting if B // tb >= 2]
    return max(multi_step) if multi_step else max(fitting)


def attention_forward(batch_hidden, batch_masks, weight, bias, query, *,
                      tb=None, compute_dtype=jnp.bfloat16):
    """batch_hidden: (B, S, H); batch_masks: (B, S) 0/1.

    Returns (batch_outputs (B, H) f32, attn_scores (B, S) f32) with the same
    semantics as the PyTorch module's forward. `compute_dtype` is the MXU
    operand dtype (bf16 default halves HBM traffic; epilogue stays f32).
    """
    B, S, H = batch_hidden.shape
    vmem_limit = _vmem_limit_bytes()
    in_itemsize = jnp.dtype(compute_dtype).itemsize
    if tb is None:
        tb = _pick_tb(B, S, H, in_itemsize, budget_bytes=vmem_limit // 2)
    assert B % tb == 0, f"tb={tb} must divide B={B}"

    hidden = batch_hidden.astype(compute_dtype)
    w = weight.astype(compute_dtype)
    masks = batch_masks.reshape(B, S).astype(jnp.float32)
    bias2 = bias.reshape(1, H).astype(jnp.float32)
    query2 = query.reshape(1, H).astype(jnp.float32)

    def call(single_buffer_resident):
        # Constant-index operands (weight/bias/query) only need one buffer.
        resident = ({"pipeline_mode": pl.Buffered(1)}
                    if single_buffer_resident else {})
        in_specs = [
            pl.BlockSpec((tb, S, H), lambda b: (b, 0, 0)),          # hidden
            pl.BlockSpec((tb, S), lambda b: (b, 0)),                # mask
            pl.BlockSpec((H, H), lambda b: (0, 0), **resident),     # weight
            pl.BlockSpec((1, H), lambda b: (0, 0), **resident),     # bias
            pl.BlockSpec((1, H), lambda b: (0, 0), **resident),     # query
        ]
        return pl.pallas_call(
            _attention_kernel,
            out_shape=(
                jax.ShapeDtypeStruct((B, H), jnp.float32),   # batch_outputs
                jax.ShapeDtypeStruct((B, S), jnp.float32),   # attn_scores
            ),
            grid_spec=pltpu.PrefetchScalarGridSpec(
                num_scalar_prefetch=0,
                grid=(B // tb,),
                in_specs=in_specs,
                out_specs=[
                    pl.BlockSpec((tb, H), lambda b: (b, 0)),         # pooled
                    pl.BlockSpec((tb, S), lambda b: (b, 0)),         # attn
                ],
            ),
            compiler_params=pltpu.CompilerParams(
                dimension_semantics=("parallel",),
                vmem_limit_bytes=vmem_limit),
        )(hidden, masks, w, bias2, query2)

    try:
        return call(True)
    except Exception:
        # Fallback if this jax build rejects pipeline_mode=pl.Buffered(1);
        # identical semantics, just double-buffers the resident operands.
        return call(False)


def attention_ref(batch_hidden, batch_masks, weight, bias, query,
                  compute_dtype=jnp.float32):
    """Pure-JAX reference mirroring the PyTorch forward (optionally with the
    same bf16 operand rounding as the kernel, f32 accumulation)."""
    h = batch_hidden.astype(compute_dtype)
    w = weight.astype(compute_dtype)
    key = jnp.matmul(h, w, preferred_element_type=jnp.float32) + bias  # (B,S,H)
    outputs = jnp.matmul(key, query.astype(jnp.float32))               # (B,S)
    fill = (1.0 - batch_masks) != 0
    masked_outputs = jnp.where(fill, jnp.float32(-1e32), outputs)
    attn = jax.nn.softmax(masked_outputs, axis=1)
    masked_attn = jnp.where(fill, 0.0, attn)
    batch_outputs = jnp.einsum("bs,bsh->bh", masked_attn, key)
    return batch_outputs, attn


if __name__ == "__main__":
    B, S, H = 2, 8, 32
    root = jax.random.PRNGKey(0)
    k_h, k_w, k_q, k_h2, k_len = jax.random.split(root, 5)

    # Parameters (deterministic, matching the module's __init__ distributions)
    weight = 0.05 * jax.random.normal(k_w, (H, H), dtype=jnp.float32)
    bias = jnp.zeros((H,), dtype=jnp.float32)
    query = 0.05 * jax.random.normal(k_q, (H,), dtype=jnp.float32)

    # --- small case (B=2): f32 compute path, strict check vs f32 reference ---
    batch_hidden = jax.random.normal(k_h, (B, S, H), dtype=jnp.float32)
    lengths = jnp.array([S, 5], dtype=jnp.int32)
    batch_masks = (jnp.arange(S)[None, :] < lengths[:, None]).astype(jnp.float32)

    out, attn = attention_forward(batch_hidden, batch_masks, weight, bias, query,
                                  compute_dtype=jnp.float32)
    out, attn = jax.block_until_ready((out, attn))
    out_r, attn_r = attention_ref(batch_hidden, batch_masks, weight, bias, query)
    assert jnp.allclose(out, out_r, atol=1e-5, rtol=1e-5)
    assert jnp.allclose(attn, attn_r, atol=1e-6, rtol=1e-5)

    # --- larger batch: bf16 MXU operands (default), multi-step grid ---
    B2 = 32
    hidden2 = jax.random.normal(k_h2, (B2, S, H), dtype=jnp.float32)
    lengths2 = jax.random.randint(k_len, (B2,), 1, S + 1)
    masks2 = (jnp.arange(S)[None, :] < lengths2[:, None]).astype(jnp.float32)

    out2, attn2 = attention_forward(hidden2, masks2, weight, bias, query)
    out2, attn2 = jax.block_until_ready((out2, attn2))
    # Same-precision reference (bf16 operands, f32 accumulate/epilogue):
    out2_r16, attn2_r16 = attention_ref(hidden2, masks2, weight, bias, query,
                                        compute_dtype=jnp.bfloat16)
    assert jnp.allclose(out2, out2_r16, atol=1e-4, rtol=1e-3)
    assert jnp.allclose(attn2, attn2_r16, atol=1e-5, rtol=1e-4)
    # Sanity: bf16 path is a close approximation of the full-f32 reference.
    out2_r, attn2_r = attention_ref(hidden2, masks2, weight, bias, query)
    assert jnp.allclose(out2, out2_r, atol=3e-2, rtol=3e-2)
    assert jnp.allclose(attn2, attn2_r, atol=3e-2, rtol=3e-2)

    # --- explicit tb override (8-row blocks, grid of 4), f32 path ---
    out3, attn3 = attention_forward(hidden2, masks2, weight, bias, query, tb=8,
                                    compute_dtype=jnp.float32)
    out3, attn3 = jax.block_until_ready((out3, attn3))
    assert jnp.allclose(out3, out2_r, atol=1e-5, rtol=1e-5)
    assert jnp.allclose(attn3, attn2_r, atol=1e-6, rtol=1e-5)

    print("KERNEL_OK")
</pallas_src>

<mosaic_0001>
module attributes {stable_mosaic.version = 11 : i64} {
  func.func @_attention_kernel(%arg0: i32, %arg1: memref<2x8x32xf32, #tpu.memory_space<vmem>>, %arg2: memref<2x8xf32, #tpu.memory_space<vmem>>, %arg3: memref<32x32xf32, #tpu.memory_space<vmem>>, %arg4: memref<1x32xf32, #tpu.memory_space<vmem>>, %arg5: memref<1x32xf32, #tpu.memory_space<vmem>>, %arg6: memref<2x32xf32, #tpu.memory_space<vmem>>, %arg7: memref<2x8xf32, #tpu.memory_space<vmem>>) attributes {dimension_semantics = [#tpu.dimension_semantics<parallel>], iteration_bounds = array<i64: 1>, scalar_prefetch = 0 : i64, scratch_operands = 0 : i64, tpu.core_type = #tpu.core_type<tc>, window_params = [{transform_indices = @transform_0, window_bounds = array<i64: 2, 8, 32>}, {transform_indices = @transform_1, window_bounds = array<i64: 2, 8>}, {pipeline_mode = #tpu.pipeline_mode<synchronous>, transform_indices = @transform_2, window_bounds = array<i64: 32, 32>}, {pipeline_mode = #tpu.pipeline_mode<synchronous>, transform_indices = @transform_3, window_bounds = array<i64: 1, 32>}, {pipeline_mode = #tpu.pipeline_mode<synchronous>, transform_indices = @transform_4, window_bounds = array<i64: 1, 32>}, {transform_indices = @transform_5, window_bounds = array<i64: 2, 32>}, {transform_indices = @transform_6, window_bounds = array<i64: 2, 8>}]} {
    %c0 = arith.constant 0 : index
    %c0_0 = arith.constant 0 : index
    %c0_1 = arith.constant 0 : index
    %0 = vector.load %arg1[%c0, %c0_0, %c0_1] : memref<2x8x32xf32, #tpu.memory_space<vmem>>, vector<2x8x32xf32>
    %1 = vector.shape_cast %0 : vector<2x8x32xf32> to vector<16x32xf32>
    %c0_2 = arith.constant 0 : index
    %c0_3 = arith.constant 0 : index
    %2 = vector.load %arg3[%c0_2, %c0_3] : memref<32x32xf32, #tpu.memory_space<vmem>>, vector<32x32xf32>
    %cst = arith.constant dense<0.000000e+00> : vector<16x32xf32>
    %3 = tpu.matmul %1, %2, %cst {dimension_numbers = #tpu.dot_dimension_numbers<[1], [0], [0], [1], [0, 0, 1, 1], [], []>} : vector<16x32xf32>, vector<32x32xf32>, vector<16x32xf32> -> vector<16x32xf32>
    %c0_4 = arith.constant 0 : index
    %c0_5 = arith.constant 0 : index
    %4 = vector.load %arg4[%c0_4, %c0_5] : memref<1x32xf32, #tpu.memory_space<vmem>>, vector<1x32xf32>
    %5 = vector.broadcast %4 : vector<1x32xf32> to vector<16x32xf32>
    %6 = arith.addf %3, %5 : vector<16x32xf32>
    %7 = vector.shape_cast %6 : vector<16x32xf32> to vector<2x8x32xf32>
    %c0_6 = arith.constant 0 : index
    %c0_7 = arith.constant 0 : index
    %8 = vector.load %arg5[%c0_6, %c0_7] : memref<1x32xf32, #tpu.memory_space<vmem>>, vector<1x32xf32>
    %9 = vector.shape_cast %8 : vector<1x32xf32> to vector<1x1x32xf32>
    %10 = vector.broadcast %9 : vector<1x1x32xf32> to vector<2x8x32xf32>
    %11 = arith.mulf %7, %10 : vector<2x8x32xf32>
    %cst_8 = arith.constant dense<0.000000e+00> : vector<2x8xf32>
    %12 = vector.multi_reduction <add>, %11, %cst_8 [2] : vector<2x8x32xf32> to vector<2x8xf32>
    %c0_9 = arith.constant 0 : index
    %c0_10 = arith.constant 0 : index
    %13 = vector.load %arg2[%c0_9, %c0_10] : memref<2x8xf32, #tpu.memory_space<vmem>>, vector<2x8xf32>
    %cst_11 = arith.constant 0.000000e+00 : f32
    %14 = vector.broadcast %cst_11 : f32 to vector<2x8xf32>
    %15 = arith.cmpf one, %13, %14 : vector<2x8xf32>
    %cst_12 = arith.constant -1.000000e+32 : f32
    %16 = vector.broadcast %cst_12 : f32 to vector<2x8xf32>
    %17 = arith.select %15, %12, %16 : vector<2x8xi1>, vector<2x8xf32>
    %cst_13 = arith.constant dense<0xFF800000> : vector<2xf32>
    %18 = vector.multi_reduction <maximumf>, %17, %cst_13 [1] : vector<2x8xf32> to vector<2xf32>
    %19 = vector.shape_cast %18 : vector<2xf32> to vector<2x1xf32>
    %20 = vector.broadcast %19 : vector<2x1xf32> to vector<2x8xf32>
    %21 = arith.subf %17, %20 : vector<2x8xf32>
    %22 = math.exp %21 : vector<2x8xf32>
    %cst_14 = arith.constant dense<0.000000e+00> : vector<2xf32>
    %23 = vector.multi_reduction <add>, %22, %cst_14 [1] : vector<2x8xf32> to vector<2xf32>
    %24 = vector.shape_cast %23 : vector<2xf32> to vector<2x1xf32>
    %25 = tpu.reciprocal %24 : vector<2x1xf32> -> vector<2x1xf32>
    %26 = vector.broadcast %25 : vector<2x1xf32> to vector<2x8xf32>
    %27 = arith.mulf %22, %26 : vector<2x8xf32>
    %cst_15 = arith.constant 0.000000e+00 : f32
    %28 = vector.broadcast %cst_15 : f32 to vector<2x8xf32>
    %29 = arith.cmpf one, %13, %28 : vector<2x8xf32>
    %cst_16 = arith.constant 0.000000e+00 : f32
    %30 = vector.broadcast %cst_16 : f32 to vector<2x8xf32>
    %31 = arith.select %29, %27, %30 : vector<2x8xi1>, vector<2x8xf32>
    %32 = vector.shape_cast %31 : vector<2x8xf32> to vector<2x8x1xf32>
    %33 = vector.broadcast %32 : vector<2x8x1xf32> to vector<2x8x32xf32>
    %34 = arith.mulf %33, %7 : vector<2x8x32xf32>
    %cst_17 = arith.constant dense<0.000000e+00> : vector<2x32xf32>
    %35 = vector.multi_reduction <add>, %34, %cst_17 [1] : vector<2x8x32xf32> to vector<2x32xf32>
    %c0_18 = arith.constant 0 : index
    %c0_19 = arith.constant 0 : index
    %36 = vector.load %arg6[%c0_18, %c0_19] : memref<2x32xf32, #tpu.memory_space<vmem>>, vector<2x32xf32>
    tpu.vector_store %arg6[%c0_18, %c0_19], %35 {strides = array<i32>} : memref<2x32xf32, #tpu.memory_space<vmem>>, vector<2x32xf32>,
    %c0_20 = arith.constant 0 : index
    %c0_21 = arith.constant 0 : index
    %37 = vector.load %arg7[%c0_20, %c0_21] : memref<2x8xf32, #tpu.memory_space<vmem>>, vector<2x8xf32>
    tpu.vector_store %arg7[%c0_20, %c0_21], %27 {strides = array<i32>} : memref<2x8xf32, #tpu.memory_space<vmem>>, vector<2x8xf32>,
    return
  }
  func.func @transform_0(%arg0: i32) -> (i32, i32, i32) {
    %c0_i32 = arith.constant 0 : i32
    %c0_i32_0 = arith.constant 0 : i32
    %c0_i32_1 = arith.constant 0 : i32
    return %arg0, %c0_i32, %c0_i32_0 : i32, i32, i32
  }
  func.func @transform_1(%arg0: i32) -> (i32, i32) {
    %c0_i32 = arith.constant 0 : i32
    %c0_i32_0 = arith.constant 0 : i32
    return %arg0, %c0_i32 : i32, i32
  }
  func.func @transform_2(%arg0: i32) -> (i32, i32) {
    %c0_i32 = arith.constant 0 : i32
    %c0_i32_0 = arith.constant 0 : i32
    %c0_i32_1 = arith.constant 0 : i32
    return %c0_i32, %c0_i32_0 : i32, i32
  }
  func.func @transform_3(%arg0: i32) -> (i32, i32) {
    %c0_i32 = arith.constant 0 : i32
    %c0_i32_0 = arith.constant 0 : i32
    %c0_i32_1 = arith.constant 0 : i32
    return %c0_i32, %c0_i32_0 : i32, i32
  }
  func.func @transform_4(%arg0: i32) -> (i32, i32) {
    %c0_i32 = arith.constant 0 : i32
    %c0_i32_0 = arith.constant 0 : i32
    %c0_i32_1 = arith.constant 0 : i32
    return %c0_i32, %c0_i32_0 : i32, i32
  }
  func.func @transform_5(%arg0: i32) -> (i32, i32) {
    %c0_i32 = arith.constant 0 : i32
    %c0_i32_0 = arith.constant 0 : i32
    return %arg0, %c0_i32 : i32, i32
  }
  func.func @transform_6(%arg0: i32) -> (i32, i32) {
    %c0_i32 = arith.constant 0 : i32
    %c0_i32_0 = arith.constant 0 : i32
    return %arg0, %c0_i32 : i32, i32
  }
}

module attributes {stable_mosaic.version = 11 : i64} {
  func.func @_attention_kernel(%arg0: i32, %arg1: memref<2x8x32xf32, #tpu.memory_space<vmem>>, %arg2: memref<2x8xf32, #tpu.memory_space<vmem>>, %arg3: memref<32x32xf32, #tpu.memory_space<vmem>>, %arg4: memref<1x32xf32, #tpu.memory_space<vmem>>, %arg5: memref<1x32xf32, #tpu.memory_space<vmem>>, %arg6: memref<2x32xf32, #tpu.memory_space<vmem>>, %arg7: memref<2x8xf32, #tpu.memory_space<vmem>>) attributes {dimension_semantics = [#tpu.dimension_semantics<parallel>], iteration_bounds = array<i64: 1>, scalar_prefetch = 0 : i64, scratch_operands = 0 : i64, tpu.core_type = #tpu.core_type<tc>, window_params = [{transform_indices = @transform_0, window_bounds = array<i64: 2, 8, 32>}, {transform_indices = @transform_1, window_bounds = array<i64: 2, 8>}, {pipeline_mode = #tpu.pipeline_mode<synchronous>, transform_indices = @transform_2, window_bounds = array<i64: 32, 32>}, {pipeline_mode = #tpu.pipeline_mode<synchronous>, transform_indices = @transform_3, window_bounds = array<i64: 1, 32>}, {pipeline_mode = #tpu.pipeline_mode<synchronous>, transform_indices = @transform_4, window_bounds = array<i64: 1, 32>}, {transform_indices = @transform_5, window_bounds = array<i64: 2, 32>}, {transform_indices = @transform_6, window_bounds = array<i64: 2, 8>}]} {
    %c0 = arith.constant 0 : index
    %c0_0 = arith.constant 0 : index
    %c0_1 = arith.constant 0 : index
    %0 = vector.load %arg1[%c0, %c0_0, %c0_1] : memref<2x8x32xf32, #tpu.memory_space<vmem>>, vector<2x8x32xf32>
    %1 = vector.shape_cast %0 : vector<2x8x32xf32> to vector<16x32xf32>
    %c0_2 = arith.constant 0 : index
    %c0_3 = arith.constant 0 : index
    %2 = vector.load %arg3[%c0_2, %c0_3] : memref<32x32xf32, #tpu.memory_space<vmem>>, vector<32x32xf32>
    %cst = arith.constant dense<0.000000e+00> : vector<16x32xf32>
    %3 = tpu.matmul %1, %2, %cst {dimension_numbers = #tpu.dot_dimension_numbers<[1], [0], [0], [1], [0, 0, 1, 1], [], []>} : vector<16x32xf32>, vector<32x32xf32>, vector<16x32xf32> -> vector<16x32xf32>
    %c0_4 = arith.constant 0 : index
    %c0_5 = arith.constant 0 : index
    %4 = vector.load %arg4[%c0_4, %c0_5] : memref<1x32xf32, #tpu.memory_space<vmem>>, vector<1x32xf32>
    %5 = vector.broadcast %4 : vector<1x32xf32> to vector<16x32xf32>
    %6 = arith.addf %3, %5 : vector<16x32xf32>
    %7 = vector.shape_cast %6 : vector<16x32xf32> to vector<2x8x32xf32>
    %c0_6 = arith.constant 0 : index
    %c0_7 = arith.constant 0 : index
    %8 = vector.load %arg5[%c0_6, %c0_7] : memref<1x32xf32, #tpu.memory_space<vmem>>, vector<1x32xf32>
    %9 = vector.shape_cast %8 : vector<1x32xf32> to vector<1x1x32xf32>
    %10 = vector.broadcast %9 : vector<1x1x32xf32> to vector<2x8x32xf32>
    %11 = arith.mulf %7, %10 : vector<2x8x32xf32>
    %cst_8 = arith.constant dense<0.000000e+00> : vector<2x8xf32>
    %12 = vector.multi_reduction <add>, %11, %cst_8 [2] : vector<2x8x32xf32> to vector<2x8xf32>
    %c0_9 = arith.constant 0 : index
    %c0_10 = arith.constant 0 : index
    %13 = vector.load %arg2[%c0_9, %c0_10] : memref<2x8xf32, #tpu.memory_space<vmem>>, vector<2x8xf32>
    %cst_11 = arith.constant 0.000000e+00 : f32
    %14 = vector.broadcast %cst_11 : f32 to vector<2x8xf32>
    %15 = arith.cmpf one, %13, %14 : vector<2x8xf32>
    %cst_12 = arith.constant -1.000000e+32 : f32
    %16 = vector.broadcast %cst_12 : f32 to vector<2x8xf32>
    %17 = arith.select %15, %12, %16 : vector<2x8xi1>, vector<2x8xf32>
    %cst_13 = arith.constant dense<0xFF800000> : vector<2xf32>
    %18 = vector.multi_reduction <maximumf>, %17, %cst_13 [1] : vector<2x8xf32> to vector<2xf32>
    %19 = vector.shape_cast %18 : vector<2xf32> to vector<2x1xf32>
    %20 = vector.broadcast %19 : vector<2x1xf32> to vector<2x8xf32>
    %21 = arith.subf %17, %20 : vector<2x8xf32>
    %22 = math.exp %21 : vector<2x8xf32>
    %cst_14 = arith.constant dense<0.000000e+00> : vector<2xf32>
    %23 = vector.multi_reduction <add>, %22, %cst_14 [1] : vector<2x8xf32> to vector<2xf32>
    %24 = vector.shape_cast %23 : vector<2xf32> to vector<2x1xf32>
    %25 = tpu.reciprocal %24 : vector<2x1xf32> -> vector<2x1xf32>
    %26 = vector.broadcast %25 : vector<2x1xf32> to vector<2x8xf32>
    %27 = arith.mulf %22, %26 : vector<2x8xf32>
    %cst_15 = arith.constant 0.000000e+00 : f32
    %28 = vector.broadcast %cst_15 : f32 to vector<2x8xf32>
    %29 = arith.cmpf one, %13, %28 : vector<2x8xf32>
    %cst_16 = arith.constant 0.000000e+00 : f32
    %30 = vector.broadcast %cst_16 : f32 to vector<2x8xf32>
    %31 = arith.select %29, %27, %30 : vector<2x8xi1>, vector<2x8xf32>
    %32 = vector.shape_cast %31 : vector<2x8xf32> to vector<2x8x1xf32>
    %33 = vector.broadcast %32 : vector<2x8x1xf32> to vector<2x8x32xf32>
    %34 = arith.mulf %33, %7 : vector<2x8x32xf32>
    %cst_17 = arith.constant dense<0.000000e+00> : vector<2x32xf32>
    %35 = vector.multi_reduction <add>, %34, %cst_17 [1] : vector<2x8x32xf32> to vector<2x32xf32>
    %c0_18 = arith.constant 0 : index
    %c0_19 = arith.constant 0 : index
    %36 = vector.load %arg6[%c0_18, %c0_19] : memref<2x32xf32, #tpu.memory_space<vmem>>, vector<2x32xf32>
    tpu.vector_store %arg6[%c0_18, %c0_19], %35 {strides = array<i32>} : memref<2x32xf32, #tpu.memory_space<vmem>>, vector<2x32xf32>,
    %c0_20 = arith.constant 0 : index
    %c0_21 = arith.constant 0 : index
    %37 = vector.load %arg7[%c0_20, %c0_21] : memref<2x8xf32, #tpu.memory_space<vmem>>, vector<2x8xf32>
    tpu.vector_store %arg7[%c0_20, %c0_21], %27 {strides = array<i32>} : memref<2x8xf32, #tpu.memory_space<vmem>>, vector<2x8xf32>,
    return
  }
  func.func @transform_0(%arg0: i32) -> (i32, i32, i32) {
    %c0_i32 = arith.constant 0 : i32
    %c0_i32_0 = arith.constant 0 : i32
    %c0_i32_1 = arith.constant 0 : i32
    return %arg0, %c0_i32, %c0_i32_0 : i32, i32, i32
  }
  func.func @transform_1(%arg0: i32) -> (i32, i32) {
    %c0_i32 = arith.constant 0 : i32
    %c0_i32_0 = arith.constant 0 : i32
    return %arg0, %c0_i32 : i32, i32
  }
  func.func @transform_2(%arg0: i32) -> (i32, i32) {
    %c0_i32 = arith.constant 0 : i32
    %c0_i32_0 = arith.constant 0 : i32
    %c0_i32_1 = arith.constant 0 : i32
    return %c0_i32, %c0_i32_0 : i32, i32
  }
  func.func @transform_3(%arg0: i32) -> (i32, i32) {
    %c0_i32 = arith.constant 0 : i32
    %c0_i32_0 = arith.constant 0 : i32
    %c0_i32_1 = arith.constant 0 : i32
    return %c0_i32, %c0_i32_0 : i32, i32
  }
  func.func @transform_4(%arg0: i32) -> (i32, i32) {
    %c0_i32 = arith.constant 0 : i32
    %c0_i32_0 = arith.constant 0 : i32
    %c0_i32_1 = arith.constant 0 : i32
    return %c0_i32, %c0_i32_0 : i32, i32
  }
  func.func @transform_5(%arg0: i32) -> (i32, i32) {
    %c0_i32 = arith.constant 0 : i32
    %c0_i32_0 = arith.constant 0 : i32
    return %arg0, %c0_i32 : i32, i32
  }
  func.func @transform_6(%arg0: i32) -> (i32, i32) {
    %c0_i32 = arith.constant 0 : i32
    %c0_i32_0 = arith.constant 0 : i32
    return %arg0, %c0_i32 : i32, i32
  }
}

</mosaic_0001>

<bundles_post_ra>
// kernel: tpu_custom_call.1
= control target key start
LH: loop header
LB: loop body
LE: loop exit
PB: predicated region body
PF: predicated region fallthrough
CT: control target
= control target key end

     0   :  { %12 = vsyncpa [#allocation3], 0  ;;  %s506_s0 = inlined_call_operand.hbm [shape: f32[2,8,32], index: 0, kind: input, shape index: {}]   ;;  %s507_s1 = inlined_call_operand.vmem [shape: f32[2,8], index: 1, kind: input, shape index: {}]   ;;  %s508_s2 = inlined_call_operand.hbm [shape: f32[32,32], index: 2, kind: input, shape index: {}]   ;;  %s509_s3 = inlined_call_operand.vmem [shape: f32[1,32], index: 3, kind: input, shape index: {}]   ;;  %s510_s4 = inlined_call_operand.vmem [shape: f32[1,32], index: 4, kind: input, shape index: {}]   ;;  %s511_s5 = inlined_call_operand.hbm [shape: f32[2,32], index: 5, kind: output, shape index: {0}]   ;;  %s512_s6 = inlined_call_operand.hbm [shape: f32[2,8], index: 6, kind: output, shape index: {1}]  }
   0x1   :  { %13 = vsyncpa [#allocation6], 0 }
   0x2   :  { %14 = vsyncpa [#allocation4], 0 }
   0x3   :  { %15 = vsyncpa [#allocation9], 0  ;;  %s395_s21 = smov [#allocation2]   ;;  %s299_s25 = scalar_lea.hbm %s506_s0, 256 }
   0x4   :  { %s21_s22 = sshll.u32 %s395_s21, 4  ;;  %p300_p0 = scmp.ne.s32.totalorder %s506_s0, %s299_s25  ;;  %s22_s22 = int_to_ptr.vmem [resolvable:$true] %s21_s22 }
   0x5   :  { %p303_p1 = scmp.lt.u32.totalorder %s299_s25, %s506_s0 }
   0x7   :  { %p305_p2 = pnand %p303_p1, %p300_p0 }
   0x9   :  { %308 = shalt.err (!%p305_p2)
}
   0xa   :  { %s309_s30 = scalar_lea.vmem %s22_s22, 256  ;;  %p314_p4 = scmp.lt.s32.totalorder %s22_s22, %s22_s22 }
   0xb   :  { %p310_p3 = scmp.ne.s32.totalorder %s22_s22, %s309_s30  ;;  %p315_p5 = scmp.lt.s32.totalorder %s309_s30, %s309_s30 }
   0xd   :  { %p316_p6 = por %p315_p5, %p314_p4 }
   0xf   :  { %p317_p7 = pnand %p316_p6, %p310_p3 }
  0x11   :  { %320 = shalt.err (!%p317_p7)
}
  0x12   :  { %s396_s7 = smov 128   ;;  %s397_s8 = smov 8  }
  0x13   :  { %27 = dma.hbm_to_vmem [thread:$0]  %s506_s0, 256, %s22_s22, [#allocation3], %s396_s7, %s396_s7, %s397_s8  }
  0x14   :  { %s398_s11 = smov [#allocation5]   ;;  %s321_s15 = scalar_lea.hbm %s508_s2, 512 }
  0x15   :  { %s35_s12 = sshll.u32 %s398_s11, 4  ;;  %p322_p8 = scmp.ne.s32.totalorder %s508_s2, %s321_s15  ;;  %s36_s12 = int_to_ptr.vmem [resolvable:$true] %s35_s12 }
  0x16   :  { %p325_p9 = scmp.lt.u32.totalorder %s321_s15, %s508_s2 }
  0x18   :  { %p327_p10 = pnand %p325_p9, %p322_p8 }
  0x1a   :  { %330 = shalt.err (!%p327_p10)
}
  0x1b   :  { %s331_s20 = scalar_lea.vmem %s36_s12, 512  ;;  %p336_p12 = scmp.lt.s32.totalorder %s36_s12, %s36_s12 }
  0x1c   :  { %p332_p11 = scmp.ne.s32.totalorder %s36_s12, %s331_s20  ;;  %p337_p13 = scmp.lt.s32.totalorder %s331_s20, %s331_s20 }
  0x1e   :  { %p338_p0 = por %p337_p13, %p336_p12 }
  0x20   :  { %p339_p1 = pnand %p338_p0, %p332_p11 }
  0x22   :  { %342 = shalt.err (!%p339_p1)
}
  0x23   :  { %41 = dma.hbm_to_vmem [thread:$0]  %s508_s2, 512, %s36_s12, [#allocation6], %s396_s7, %s396_s7, %s397_s8  }
  0x24   :  { %387 = dma.done.wait [#allocation3], 256  }
  0x25   :  { %388 = vsyncadd [#allocation3], 4294967040 }
  0x26   :  { %389 = dma.done.wait [#allocation6], 512  }
  0x27   :  { %390 = vsyncadd [#allocation6], 4294966784  ;;  %vm65_vm0 = vcmask 261120   ;;  %v54_v0 = vld [vmem:[#allocation5] sm:$0xff]  ;;  %v55_v1 = vld [vmem:[#allocation5 + $0x8] sm:$0xff]  ;;  %v166_v18 = vlaneseq  ;;  %vm176_vm1 = vcmask 1041409  }
  0x28   :  { %v56_v2 = vld [vmem:[#allocation5 + $0x10] sm:$0xff]  ;;  %v281_v3 = vpack.c.bf16 %v55_v1, %v54_v0  ;;  %v57_v4 = vld [vmem:[#allocation5 + $0x18] sm:$0xff]  ;;  %vm180_vm3 = vcmask 58368  }
  0x29   :  { %v52_v5 = vld [vmem:[#allocation2] sm:$0xff]  ;;  %v285_v6 = vpack.c.bf16 %v57_v4, %v56_v2  ;;  %v53_v7 = vld [vmem:[#allocation2 + $0x8] sm:$0xff]  ;;  %v167_v19 = vand.u32 127, %v166_v18  ;;  %v169_v20 = vshrl.u32 %v166_v18, 7 }
  0x2a   :  { %278 = vmatprep.mubr.msk.f32.mxu0 %vm65_vm0, %v52_v5  ;;  %282 = vmatprep.subr.bf16.mxu0 %v281_v3  ;;  %v260_v8 = vld [vmem:[%s509_s3] ss:$0 sm:$0xff] }
  0x2b   :  { %284 = vmatpush3.bf16.msra.mxu0 %v281_v3  ;;  %v263_v11 = vld [vmem:[%s510_s4] ss:$0 sm:$0xff]  ;;  %v170_v22 = vsub.s32 %v167_v19, %v169_v20  ;;  %v202_v37 = vsub.s32 1, %v169_v20  ;;  %v195_v38 = vsub.s32 0, %v169_v20 }
  0x2c   :  { %286 = vmatprep.subr.bf16.mxu0 %v285_v6  ;;  %v162_v23 = vld [vmem:[%s507_s1] sm:$0x3]  ;;  %s399_s1 = smov [#allocation8]  }
  0x2d   :  { %vm163_vm2 = vcmp.ne.f32.partialorder %v162_v23, 0.0  ;;  %s246_s4 = sshll.u32 %s399_s1, 4  ;;  %s247_s4 = int_to_ptr.vmem [resolvable:$true] %s246_s4 }
  0x2e   :  { %s343_s26 = scalar_lea.vmem %s247_s4, 32  ;;  %p348_p3 = scmp.lt.s32.totalorder %s247_s4, %s247_s4 }
  0x2f   :  { %288 = vmatpush3.bf16.msra.mxu0 %v285_v6  ;;  %p344_p2 = scmp.ne.s32.totalorder %s247_s4, %s343_s26  ;;  %p349_p4 = scmp.lt.s32.totalorder %s343_s26, %s343_s26 }
  0x31   :  { %p350_p5 = por %p349_p4, %p348_p3 }
  0x32   :  { %279 = vmatmul.mubr.msk.f32.vlgmr.msra.gmra.mrb[0].mxu0 %vm65_vm0, %v53_v7 }
  0x33   :  { %p351_p6 = pnand %p350_p5, %p344_p2 }
 0x105   :  { %v280_v9 = vpop.f32.mrb[0].mxu0 }
 0x106   :  { %v138_v10 = vpop.f32.mrb[1].mxu0  ;;  %v144_v12 = vadd.f32 %v280_v9, %v260_v8 }
 0x107   :  { %v139_v13 = vadd.f32 %v260_v8, %v138_v10 }
 0x108   :  { %v155_v16 = vmul.f32 %v263_v11, %v144_v12 }
 0x109   :  { %v154_v14 = vmul.f32 %v263_v11, %v139_v13 }
 0x10a   :  { %v159_v17 = vsel %vm65_vm0, %v155_v16, 0.0 }
 0x10b   :  { %v156_v15 = vsel %vm65_vm0, %v154_v14, 0.0 }
 0x10c   :  { %157 = vadd.xlane.f32.xlu0 %v156_v15 }
 0x110   :  { %160 = vadd.xlane.f32.xlu0 %v159_v17 }
 0x199   :  { %v158_v21 = vpop.xlane.xlu0 %157 }
 0x19a   :  { %v171_v25 = vrot.slane %v158_v21, %v170_v22 }
 0x19d   :  { %v161_v24 = vpop.xlane.xlu0 %160 }
 0x19e   :  { %v175_v26 = vrot.slane %v161_v24, %v170_v22 }
 0x1a0   :  { %v177_v27 = vsel %vm176_vm1, %v175_v26, %v171_v25 }
 0x1a1   :  { %v179_v28 = vsel %vm163_vm2, %v177_v27, -1e+32 }
 0x1a2   :  { %v181_v29 = vsel %vm180_vm3, %v179_v28, -inf }
 0x1a3   :  { %182 = vmax.xlane.f32.xlu1 %v181_v29 }
 0x230   :  { %v183_v30 = vpop.xlane.xlu1 %182 }
 0x231   :  { %v184_v31 = vsub.f32 %v179_v28, %v183_v30 }
 0x233   :  { %v185_v32 = vmul.f32 1.442695, %v184_v31 }
 0x235   :  { %295 = vpow2.f32 %v185_v32 }
 0x23f   :  { %v296_v33 = vpop.eup %295 }
 0x240   :  { %v187_v34 = vsel %vm180_vm3, %v296_v33, 0.0 }
 0x241   :  { %188 = vadd.xlane.f32.xlu1 %v187_v34 }
 0x2ce   :  { %v189_v35 = vpop.xlane.xlu1 %188 }
 0x2cf   :  { %297 = vrcp.f32 %v189_v35 }
 0x2d9   :  { %v298_v36 = vpop.eup %297 }
 0x2da   :  { %v191_v39 = vmul.f32 %v298_v36, %v296_v33 }
 0x2dc   :  { %v192_v40 = vsel %vm163_vm2, %v191_v39, 0.0  ;;  %229 = vst.msk [vmem:[#allocation8] sm:$0x3] %vm180_vm3, %v191_v39 }
 0x2dd   :  { %v203_v41 = vrot.slane %v192_v40, %v202_v37  ;;  %v196_v42 = vrot.slane %v192_v40, %v195_v38 }
 0x2df   :  { %205 = vbcast.lane.b32.xlu1 %v203_v41, 256  ;;  %198 = vbcast.lane.b32.xlu0 %v196_v42, 256 }
 0x2e0   :  { %354 = shalt.err (!%p351_p6)
}
 0x2e1   :  { %s355_s29 = scalar_lea.hbm %s512_s6, 32 }
 0x2e2   :  { %p356_p7 = scmp.ne.s32.totalorder %s512_s6, %s355_s29  ;;  %p359_p8 = scmp.lt.u32.totalorder %s355_s29, %s512_s6 }
 0x2e4   :  { %p361_p9 = pnand %p359_p8, %p356_p7 }
 0x2e6   :  { %364 = shalt.err (!%p361_p9)
}
 0x2e7   :  { %249 = dma.vmem_to_hbm [thread:$0]  %s247_s4, 32, %s512_s6, [#allocation9]   ;;  %vm227_vm4 = vcmask 254976  }
 0x2e8   :  { %s400_s12 = smov [#allocation7]  }
 0x2e9   :  { %s236_s6 = sshll.u32 %s400_s12, 4  ;;  %s237_s6 = int_to_ptr.vmem [resolvable:$true] %s236_s6 }
 0x2ea   :  { %s365_s13 = scalar_lea.vmem %s237_s6, 32  ;;  %p370_p11 = scmp.lt.s32.totalorder %s237_s6, %s237_s6 }
 0x2eb   :  { %p366_p10 = scmp.ne.s32.totalorder %s237_s6, %s365_s13  ;;  %p371_p12 = scmp.lt.s32.totalorder %s365_s13, %s365_s13 }
 0x2ed   :  { %p372_p13 = por %p371_p12, %p370_p11 }
 0x2ef   :  { %p373_p0 = pnand %p372_p13, %p366_p10 }
 0x351   :  { %v206_v43 = vpop.permute.xlu1 %205  ;;  %v199_v44 = vpop.permute.xlu0 %198 }
 0x352   :  { %v208_v45 = vmul.f32 %v206_v43, %v144_v12  ;;  %v207_v46 = vmul.f32 %v199_v44, %v139_v13 }
 0x354   :  { %v216_v47 = vsel %vm65_vm0, %v208_v45, 0.0  ;;  %v209_v48 = vsel %vm65_vm0, %v207_v46, 0.0 }
 0x355   :  { %v217_v49 = vrot.slane %v216_v47, 4  ;;  %v210_v50 = vrot.slane %v209_v48, 4 }
 0x357   :  { %v218_v51 = vadd.f32 %v217_v49, %v216_v47  ;;  %v211_v52 = vadd.f32 %v210_v50, %v209_v48 }
 0x359   :  { %v219_v53 = vrot.slane %v218_v51, 2  ;;  %v212_v54 = vrot.slane %v211_v52, 2 }
 0x35b   :  { %v220_v55 = vadd.f32 %v219_v53, %v218_v51  ;;  %v213_v56 = vadd.f32 %v212_v54, %v211_v52 }
 0x35d   :  { %v221_v57 = vrot.slane %v220_v55, 1  ;;  %v214_v58 = vrot.slane %v213_v56, 1 }
 0x35f   :  { %v222_v59 = vadd.f32 %v221_v57, %v220_v55  ;;  %v215_v60 = vadd.f32 %v214_v58, %v213_v56 }
 0x361   :  { %v225_v61 = vsel %vm176_vm1, %v222_v59, %v215_v60 }
 0x362   :  { %228 = vst.msk [vmem:[#allocation7] sm:$0x3] %vm227_vm4, %v225_v61 }
 0x363   :  { %376 = shalt.err (!%p373_p0)
}
 0x364   :  { %s377_s16 = scalar_lea.hbm %s511_s5, 32 }
 0x365   :  { %p378_p1 = scmp.ne.s32.totalorder %s511_s5, %s377_s16  ;;  %p381_p2 = scmp.lt.u32.totalorder %s377_s16, %s511_s5 }
 0x367   :  { %p383_p3 = pnand %p381_p2, %p378_p1 }
 0x369   :  { %386 = shalt.err (!%p383_p3)
}
 0x36a   :  { %239 = dma.vmem_to_hbm [thread:$0]  %s237_s6, 32, %s511_s5, [#allocation4]  }
 0x36b   :  { %391 = dma.done.wait [#allocation4], 32  }
 0x36c   :  { %392 = vsyncadd [#allocation4], 4294967264 }
 0x36d   :  { %393 = dma.done.wait [#allocation9], 32  }
 0x36e   :  { %394 = vsyncadd [#allocation9], 4294967264 }
 0x36f   :  { %256 = vsyncpa [#allocation3], 1 }
 0x370   :  { %257 = vsyncpa [#allocation6], 1 }
 0x371   :  { %258 = vsyncpa [#allocation4], 1 }
 0x372   :  { %259 = vsyncpa [#allocation9], 1 }

// kernel: tpu_custom_call.1
= control target key start
LH: loop header
LB: loop body
LE: loop exit
PB: predicated region body
PF: predicated region fallthrough
CT: control target
= control target key end

     0   :  { %12 = vsyncpa [#allocation3], 0  ;;  %s506_s0 = inlined_call_operand.hbm [shape: f32[2,8,32], index: 0, kind: input, shape index: {}]   ;;  %s507_s1 = inlined_call_operand.vmem [shape: f32[2,8], index: 1, kind: input, shape index: {}]   ;;  %s508_s2 = inlined_call_operand.hbm [shape: f32[32,32], index: 2, kind: input, shape index: {}]   ;;  %s509_s3 = inlined_call_operand.vmem [shape: f32[1,32], index: 3, kind: input, shape index: {}]   ;;  %s510_s4 = inlined_call_operand.vmem [shape: f32[1,32], index: 4, kind: input, shape index: {}]   ;;  %s511_s5 = inlined_call_operand.hbm [shape: f32[2,32], index: 5, kind: output, shape index: {0}]   ;;  %s512_s6 = inlined_call_operand.hbm [shape: f32[2,8], index: 6, kind: output, shape index: {1}]  }
   0x1   :  { %13 = vsyncpa [#allocation6], 0 }
   0x2   :  { %14 = vsyncpa [#allocation4], 0 }
   0x3   :  { %15 = vsyncpa [#allocation9], 0  ;;  %s395_s21 = smov [#allocation2]   ;;  %s299_s25 = scalar_lea.hbm %s506_s0, 256 }
   0x4   :  { %s21_s22 = sshll.u32 %s395_s21, 4  ;;  %p300_p0 = scmp.ne.s32.totalorder %s506_s0, %s299_s25  ;;  %s22_s22 = int_to_ptr.vmem [resolvable:$true] %s21_s22 }
   0x5   :  { %p303_p1 = scmp.lt.u32.totalorder %s299_s25, %s506_s0 }
   0x7   :  { %p305_p2 = pnand %p303_p1, %p300_p0 }
   0x9   :  { %308 = shalt.err (!%p305_p2)
}
   0xa   :  { %s309_s30 = scalar_lea.vmem %s22_s22, 256  ;;  %p314_p4 = scmp.lt.s32.totalorder %s22_s22, %s22_s22 }
   0xb   :  { %p310_p3 = scmp.ne.s32.totalorder %s22_s22, %s309_s30  ;;  %p315_p5 = scmp.lt.s32.totalorder %s309_s30, %s309_s30 }
   0xd   :  { %p316_p6 = por %p315_p5, %p314_p4 }
   0xf   :  { %p317_p7 = pnand %p316_p6, %p310_p3 }
  0x11   :  { %320 = shalt.err (!%p317_p7)
}
  0x12   :  { %s396_s7 = smov 128   ;;  %s397_s8 = smov 8  }
  0x13   :  { %27 = dma.hbm_to_vmem [thread:$0]  %s506_s0, 256, %s22_s22, [#allocation3], %s396_s7, %s396_s7, %s397_s8  }
  0x14   :  { %s398_s11 = smov [#allocation5]   ;;  %s321_s15 = scalar_lea.hbm %s508_s2, 512 }
  0x15   :  { %s35_s12 = sshll.u32 %s398_s11, 4  ;;  %p322_p8 = scmp.ne.s32.totalorder %s508_s2, %s321_s15  ;;  %s36_s12 = int_to_ptr.vmem [resolvable:$true] %s35_s12 }
  0x16   :  { %p325_p9 = scmp.lt.u32.totalorder %s321_s15, %s508_s2 }
  0x18   :  { %p327_p10 = pnand %p325_p9, %p322_p8 }
  0x1a   :  { %330 = shalt.err (!%p327_p10)
}
  0x1b   :  { %s331_s20 = scalar_lea.vmem %s36_s12, 512  ;;  %p336_p12 = scmp.lt.s32.totalorder %s36_s12, %s36_s12 }
  0x1c   :  { %p332_p11 = scmp.ne.s32.totalorder %s36_s12, %s331_s20  ;;  %p337_p13 = scmp.lt.s32.totalorder %s331_s20, %s331_s20 }
  0x1e   :  { %p338_p0 = por %p337_p13, %p336_p12 }
  0x20   :  { %p339_p1 = pnand %p338_p0, %p332_p11 }
  0x22   :  { %342 = shalt.err (!%p339_p1)
}
  0x23   :  { %41 = dma.hbm_to_vmem [thread:$0]  %s508_s2, 512, %s36_s12, [#allocation6], %s396_s7, %s396_s7, %s397_s8  }
  0x24   :  { %387 = dma.done.wait [#allocation3], 256  }
  0x25   :  { %388 = vsyncadd [#allocation3], 4294967040 }
  0x26   :  { %389 = dma.done.wait [#allocation6], 512  }
  0x27   :  { %390 = vsyncadd [#allocation6], 4294966784  ;;  %vm65_vm0 = vcmask 261120   ;;  %v54_v0 = vld [vmem:[#allocation5] sm:$0xff]  ;;  %v55_v1 = vld [vmem:[#allocation5 + $0x8] sm:$0xff]  ;;  %v166_v18 = vlaneseq  ;;  %vm176_vm1 = vcmask 1041409  }
  0x28   :  { %v56_v2 = vld [vmem:[#allocation5 + $0x10] sm:$0xff]  ;;  %v281_v3 = vpack.c.bf16 %v55_v1, %v54_v0  ;;  %v57_v4 = vld [vmem:[#allocation5 + $0x18] sm:$0xff]  ;;  %vm180_vm3 = vcmask 58368  }
  0x29   :  { %v52_v5 = vld [vmem:[#allocation2] sm:$0xff]  ;;  %v285_v6 = vpack.c.bf16 %v57_v4, %v56_v2  ;;  %v53_v7 = vld [vmem:[#allocation2 + $0x8] sm:$0xff]  ;;  %v167_v19 = vand.u32 127, %v166_v18  ;;  %v169_v20 = vshrl.u32 %v166_v18, 7 }
  0x2a   :  { %278 = vmatprep.mubr.msk.f32.mxu0 %vm65_vm0, %v52_v5  ;;  %282 = vmatprep.subr.bf16.mxu0 %v281_v3  ;;  %v260_v8 = vld [vmem:[%s509_s3] ss:$0 sm:$0xff] }
  0x2b   :  { %284 = vmatpush3.bf16.msra.mxu0 %v281_v3  ;;  %v263_v11 = vld [vmem:[%s510_s4] ss:$0 sm:$0xff]  ;;  %v170_v22 = vsub.s32 %v167_v19, %v169_v20  ;;  %v202_v37 = vsub.s32 1, %v169_v20  ;;  %v195_v38 = vsub.s32 0, %v169_v20 }
  0x2c   :  { %286 = vmatprep.subr.bf16.mxu0 %v285_v6  ;;  %v162_v23 = vld [vmem:[%s507_s1] sm:$0x3]  ;;  %s399_s1 = smov [#allocation8]  }
  0x2d   :  { %vm163_vm2 = vcmp.ne.f32.partialorder %v162_v23, 0.0  ;;  %s246_s4 = sshll.u32 %s399_s1, 4  ;;  %s247_s4 = int_to_ptr.vmem [resolvable:$true] %s246_s4 }
  0x2e   :  { %s343_s26 = scalar_lea.vmem %s247_s4, 32  ;;  %p348_p3 = scmp.lt.s32.totalorder %s247_s4, %s247_s4 }
  0x2f   :  { %288 = vmatpush3.bf16.msra.mxu0 %v285_v6  ;;  %p344_p2 = scmp.ne.s32.totalorder %s247_s4, %s343_s26  ;;  %p349_p4 = scmp.lt.s32.totalorder %s343_s26, %s343_s26 }
  0x31   :  { %p350_p5 = por %p349_p4, %p348_p3 }
  0x32   :  { %279 = vmatmul.mubr.msk.f32.vlgmr.msra.gmra.mrb[0].mxu0 %vm65_vm0, %v53_v7 }
  0x33   :  { %p351_p6 = pnand %p350_p5, %p344_p2 }
 0x105   :  { %v280_v9 = vpop.f32.mrb[0].mxu0 }
 0x106   :  { %v138_v10 = vpop.f32.mrb[1].mxu0  ;;  %v144_v12 = vadd.f32 %v280_v9, %v260_v8 }
 0x107   :  { %v139_v13 = vadd.f32 %v260_v8, %v138_v10 }
 0x108   :  { %v155_v16 = vmul.f32 %v263_v11, %v144_v12 }
 0x109   :  { %v154_v14 = vmul.f32 %v263_v11, %v139_v13 }
 0x10a   :  { %v159_v17 = vsel %vm65_vm0, %v155_v16, 0.0 }
 0x10b   :  { %v156_v15 = vsel %vm65_vm0, %v154_v14, 0.0 }
 0x10c   :  { %157 = vadd.xlane.f32.xlu0 %v156_v15 }
 0x110   :  { %160 = vadd.xlane.f32.xlu0 %v159_v17 }
 0x199   :  { %v158_v21 = vpop.xlane.xlu0 %157 }
 0x19a   :  { %v171_v25 = vrot.slane %v158_v21, %v170_v22 }
 0x19d   :  { %v161_v24 = vpop.xlane.xlu0 %160 }
 0x19e   :  { %v175_v26 = vrot.slane %v161_v24, %v170_v22 }
 0x1a0   :  { %v177_v27 = vsel %vm176_vm1, %v175_v26, %v171_v25 }
 0x1a1   :  { %v179_v28 = vsel %vm163_vm2, %v177_v27, -1e+32 }
 0x1a2   :  { %v181_v29 = vsel %vm180_vm3, %v179_v28, -inf }
 0x1a3   :  { %182 = vmax.xlane.f32.xlu1 %v181_v29 }
 0x230   :  { %v183_v30 = vpop.xlane.xlu1 %182 }
 0x231   :  { %v184_v31 = vsub.f32 %v179_v28, %v183_v30 }
 0x233   :  { %v185_v32 = vmul.f32 1.442695, %v184_v31 }
 0x235   :  { %295 = vpow2.f32 %v185_v32 }
 0x23f   :  { %v296_v33 = vpop.eup %295 }
 0x240   :  { %v187_v34 = vsel %vm180_vm3, %v296_v33, 0.0 }
 0x241   :  { %188 = vadd.xlane.f32.xlu1 %v187_v34 }
 0x2ce   :  { %v189_v35 = vpop.xlane.xlu1 %188 }
 0x2cf   :  { %297 = vrcp.f32 %v189_v35 }
 0x2d9   :  { %v298_v36 = vpop.eup %297 }
 0x2da   :  { %v191_v39 = vmul.f32 %v298_v36, %v296_v33 }
 0x2dc   :  { %v192_v40 = vsel %vm163_vm2, %v191_v39, 0.0  ;;  %229 = vst.msk [vmem:[#allocation8] sm:$0x3] %vm180_vm3, %v191_v39 }
 0x2dd   :  { %v203_v41 = vrot.slane %v192_v40, %v202_v37  ;;  %v196_v42 = vrot.slane %v192_v40, %v195_v38 }
 0x2df   :  { %205 = vbcast.lane.b32.xlu1 %v203_v41, 256  ;;  %198 = vbcast.lane.b32.xlu0 %v196_v42, 256 }
 0x2e0   :  { %354 = shalt.err (!%p351_p6)
}
 0x2e1   :  { %s355_s29 = scalar_lea.hbm %s512_s6, 32 }
 0x2e2   :  { %p356_p7 = scmp.ne.s32.totalorder %s512_s6, %s355_s29  ;;  %p359_p8 = scmp.lt.u32.totalorder %s355_s29, %s512_s6 }
 0x2e4   :  { %p361_p9 = pnand %p359_p8, %p356_p7 }
 0x2e6   :  { %364 = shalt.err (!%p361_p9)
}
 0x2e7   :  { %249 = dma.vmem_to_hbm [thread:$0]  %s247_s4, 32, %s512_s6, [#allocation9]   ;;  %vm227_vm4 = vcmask 254976  }
 0x2e8   :  { %s400_s12 = smov [#allocation7]  }
 0x2e9   :  { %s236_s6 = sshll.u32 %s400_s12, 4  ;;  %s237_s6 = int_to_ptr.vmem [resolvable:$true] %s236_s6 }
 0x2ea   :  { %s365_s13 = scalar_lea.vmem %s237_s6, 32  ;;  %p370_p11 = scmp.lt.s32.totalorder %s237_s6, %s237_s6 }
 0x2eb   :  { %p366_p10 = scmp.ne.s32.totalorder %s237_s6, %s365_s13  ;;  %p371_p12 = scmp.lt.s32.totalorder %s365_s13, %s365_s13 }
 0x2ed   :  { %p372_p13 = por %p371_p12, %p370_p11 }
 0x2ef   :  { %p373_p0 = pnand %p372_p13, %p366_p10 }
 0x351   :  { %v206_v43 = vpop.permute.xlu1 %205  ;;  %v199_v44 = vpop.permute.xlu0 %198 }
 0x352   :  { %v208_v45 = vmul.f32 %v206_v43, %v144_v12  ;;  %v207_v46 = vmul.f32 %v199_v44, %v139_v13 }
 0x354   :  { %v216_v47 = vsel %vm65_vm0, %v208_v45, 0.0  ;;  %v209_v48 = vsel %vm65_vm0, %v207_v46, 0.0 }
 0x355   :  { %v217_v49 = vrot.slane %v216_v47, 4  ;;  %v210_v50 = vrot.slane %v209_v48, 4 }
 0x357   :  { %v218_v51 = vadd.f32 %v217_v49, %v216_v47  ;;  %v211_v52 = vadd.f32 %v210_v50, %v209_v48 }
 0x359   :  { %v219_v53 = vrot.slane %v218_v51, 2  ;;  %v212_v54 = vrot.slane %v211_v52, 2 }
 0x35b   :  { %v220_v55 = vadd.f32 %v219_v53, %v218_v51  ;;  %v213_v56 = vadd.f32 %v212_v54, %v211_v52 }
 0x35d   :  { %v221_v57 = vrot.slane %v220_v55, 1  ;;  %v214_v58 = vrot.slane %v213_v56, 1 }
 0x35f   :  { %v222_v59 = vadd.f32 %v221_v57, %v220_v55  ;;  %v215_v60 = vadd.f32 %v214_v58, %v213_v56 }
 0x361   :  { %v225_v61 = vsel %vm176_vm1, %v222_v59, %v215_v60 }
 0x362   :  { %228 = vst.msk [vmem:[#allocation7] sm:$0x3] %vm227_vm4, %v225_v61 }
 0x363   :  { %376 = shalt.err (!%p373_p0)
}
 0x364   :  { %s377_s16 = scalar_lea.hbm %s511_s5, 32 }
 0x365   :  { %p378_p1 = scmp.ne.s32.totalorder %s511_s5, %s377_s16  ;;  %p381_p2 = scmp.lt.u32.totalorder %s377_s16, %s511_s5 }
 0x367   :  { %p383_p3 = pnand %p381_p2, %p378_p1 }
 0x369   :  { %386 = shalt.err (!%p383_p3)
}
 0x36a   :  { %239 = dma.vmem_to_hbm [thread:$0]  %s237_s6, 32, %s511_s5, [#allocation4]  }
 0x36b   :  { %391 = dma.done.wait [#allocation4], 32  }
 0x36c   :  { %392 = vsyncadd [#allocation4], 4294967264 }
 0x36d   :  { %393 = dma.done.wait [#allocation9], 32  }
 0x36e   :  { %394 = vsyncadd [#allocation9], 4294967264 }
 0x36f   :  { %256 = vsyncpa [#allocation3], 1 }
 0x370   :  { %257 = vsyncpa [#allocation6], 1 }
 0x371   :  { %258 = vsyncpa [#allocation4], 1 }
 0x372   :  { %259 = vsyncpa [#allocation9], 1 }

</bundles_post_ra>
